<compile_context>
chip_gen: v5e
topology: v5e:2x2
jax: 0.10.0
libtpu: 0.0.40
codegen_flags: <defaults>
</compile_context>

<pallas_src>
import functools

import jax
import jax.numpy as jnp
from jax.experimental import pallas as pl
from jax.experimental.pallas import tpu as pltpu


NUM_CORES = 2                           # leading "parallel" grid axis (v7x megacore)
TARGET_TILE_BYTES = 2 * 1024 * 1024     # per-buffer query tile budget (double-buffered)
MAX_TILE_IMAGES = 256                   # bounds the (TB,1,1) label tile & intermediates


def _dfmn_loss_kernel(q_ref, p_ref, lab_ref, out_ref, *,
                      n_images, n_blocks, blocks_per_core):
    """One grid step: cross-entropy partial sum over a (TB, C, S) block of images.

    q_ref:   (TB, C, S) f32 -- TB images, channels on sublanes, spatial on lanes
    p_ref:   (W, C)     f32 -- episode prototypes (W = n_way)
    lab_ref: (TB, 1, 1) i32 -- per-image class label
    out_ref: (1, 8, 128) f32 -- per-core partial sum, resident across the step axis
    """
    core = pl.program_id(0)
    step = pl.program_id(1)

    # Output block is resident across the step axis: zero it once per core.
    @pl.when(step == 0)
    def _init():
        out_ref[...] = jnp.zeros_like(out_ref)

    tb, c_dim, s_dim = q_ref.shape
    n_way = p_ref.shape[0]

    blk_raw = core * blocks_per_core + step           # unclamped block index
    blk = jnp.minimum(blk_raw, n_blocks - 1)          # matches the clamped index_map

    # Padded grid steps (grid rounding past n_blocks) contribute nothing: skip all
    # compute (the DMA of the clamped block still happens, but that is at most one
    # extra tile per core and stays hidden under the pipeline).
    @pl.when(blk_raw < n_blocks)
    def _compute():
        q = q_ref[...]                                # (TB, C, S)
        p = p_ref[...]                                # (W, C)
        lab = lab_ref[...]                            # (TB, 1, 1)

        # -||q[b,:,s] - p[w,:]||^2 up to a per-(b,s) constant (cancels in the CE):
        #   logits[b,w,s] = 2 * <q[b,:,s], p[w,:]> - ||p[w,:]||^2
        p_b = jnp.broadcast_to(p[None], (tb, n_way, c_dim))          # (TB, W, C)
        qp = jnp.einsum("bwc,bcs->bws", p_b, q,
                        preferred_element_type=jnp.float32)          # (TB, W, S) -> MXU
        p_sq = jnp.sum(p * p, axis=1, keepdims=True)[None]           # (1, W, 1)
        logits = 2.0 * qp - p_sq                                     # (TB, W, S)

        # Cross-entropy with integer targets (sum here, mean taken in the wrapper).
        m = jnp.max(logits, axis=1, keepdims=True)                   # (TB, 1, S)
        lse = m + jnp.log(jnp.sum(jnp.exp(logits - m), axis=1, keepdims=True))
        w_iota = jax.lax.broadcasted_iota(jnp.int32, (tb, n_way, s_dim), 1)
        one_hot = (w_iota == lab).astype(jnp.float32)                # (TB, W, S)
        picked = jnp.sum(logits * one_hot, axis=1, keepdims=True)    # (TB, 1, S)
        per_pos = lse - picked                                       # (TB, 1, S)

        # Mask images past the true batch size (partial last block).
        # NOTE: out-of-range labels silently yield picked = 0 (PyTorch would raise).
        img_iota = jax.lax.broadcasted_iota(jnp.int32, (tb, 1, 1), 0)
        valid = blk * tb + img_iota < n_images
        contrib = jnp.sum(jnp.where(valid, per_pos, 0.0))

        # Accumulate the scalar redundantly over the whole resident tile (vector op
        # only, aligned full-tile writeback); the wrapper reads element [0, 0].
        out_ref[...] += contrib


def dfmn_loss_pallas(query_nchw_flat, prototypes, labels, tile_images=None):
    """query_nchw_flat: (N, C, S) f32 (NCHW with HW flattened), prototypes: (W, C) f32,
    labels: (N,) int -- one label per image. Returns the scalar mean CE loss (f32)."""
    n_img, c_dim, s_dim = query_nchw_flat.shape
    n_way = prototypes.shape[0]

    if tile_images is None:
        bytes_per_image = c_dim * s_dim * 4
        tb = max(1, TARGET_TILE_BYTES // bytes_per_image)
        tb = min(tb, max(1, TARGET_TILE_BYTES // max(1, n_way * c_dim * 4)))
        tb = max(1, min(tb, MAX_TILE_IMAGES, pl.cdiv(n_img, NUM_CORES)))
    else:
        tb = max(1, min(int(tile_images), n_img))

    n_blocks = pl.cdiv(n_img, tb)
    blocks_per_core = pl.cdiv(n_blocks, NUM_CORES)

    labels3 = labels.reshape(n_img, 1, 1).astype(jnp.int32)

    def data_map(core, step):
        # Clamp padded grid steps to the last real block (their compute is skipped).
        return (jnp.minimum(core * blocks_per_core + step, n_blocks - 1), 0, 0)

    def proto_map(core, step):
        return (0, 0)

    def out_map(core, step):
        return (core, 0, 0)

    kernel = functools.partial(
        _dfmn_loss_kernel,
        n_images=n_img, n_blocks=n_blocks, blocks_per_core=blocks_per_core)

    partials = pl.pallas_call(
        kernel,
        out_shape=jax.ShapeDtypeStruct((NUM_CORES, 8, 128), jnp.float32),
        grid_spec=pltpu.PrefetchScalarGridSpec(
            num_scalar_prefetch=0,
            grid=(NUM_CORES, blocks_per_core),
            in_specs=[
                pl.BlockSpec((tb, c_dim, s_dim), data_map),   # query images (NCHW)
                pl.BlockSpec((n_way, c_dim), proto_map),      # prototypes, replicated
                pl.BlockSpec((tb, 1, 1), data_map),           # per-image labels
            ],
            out_specs=pl.BlockSpec((1, 8, 128), out_map),     # per-core partial sums
        ),
        compiler_params=pltpu.CompilerParams(
            dimension_semantics=("parallel", "arbitrary"),
            vmem_limit_bytes=32 * 1024 * 1024,   # above v5e's 16 MiB default, < v7x phys
        ),
    )(query_nchw_flat, prototypes, labels3)

    total = jnp.sum(partials[:, 0, 0])
    return total / jnp.float32(n_img * s_dim)


# ----------------------------------------------------------------------------
# Module-equivalent wrapper (glue in plain JAX / Python)
# ----------------------------------------------------------------------------
def inverse_mapping(mapping):
    return {v: k for k, v in mapping.items()}


class DFMNLossPallas:
    """JAX/Pallas port of the PyTorch DFMNLoss forward pass."""

    def __init__(self, in_features, in_featmap_size, n_classes, key):
        self.in_features = in_features
        self.in_featmap_size = in_featmap_size
        self.n_classes = n_classes
        # nn.Linear weight (n_classes, in_features), xavier_uniform_ init (bias unused).
        bound = (6.0 / (in_features + n_classes)) ** 0.5
        self.weight = jax.random.uniform(
            key, (n_classes, in_features), jnp.float32, -bound, bound)

    def __call__(self, query_features, labels, global_classes_mapping, n_way):
        s = self.in_featmap_size
        # Episode prototypes: global prototype rows reordered so local class i = row i.
        inv_mapping = inverse_mapping(global_classes_mapping)
        indices = jnp.asarray([inv_mapping[i] for i in range(n_way)], dtype=jnp.int32)
        prototypes = jnp.take(self.weight, indices, axis=0)            # (n_way, C)

        # Consume NCHW directly: only flatten the spatial dims (no HBM transpose).
        q3 = query_features.reshape(-1, self.in_features, s * s)       # (N, C, S)
        # One label per image (the original repeats it per spatial position; all
        # featmap positions of an image share the label, so this is equivalent).
        labels_per_image = labels.reshape(-1).astype(jnp.int32)        # (N,)
        return dfmn_loss_pallas(q3, prototypes, labels_per_image)


# ----------------------------------------------------------------------------
# Pure-JAX reference (matches the PyTorch forward exactly)
# ----------------------------------------------------------------------------
def reference_loss(query_set, prototypes, labels):
    diff = query_set[:, None, :] - prototypes[None, :, :]
    logits = -jnp.sum(diff * diff, axis=-1)
    logz = jax.nn.logsumexp(logits, axis=-1)
    picked = jnp.take_along_axis(logits, labels[:, None], axis=-1)[:, 0]
    return jnp.mean(logz - picked)


if __name__ == "__main__":
    key = jax.random.PRNGKey(0)
    k_w, k_x, k_l = jax.random.split(key, 3)

    # Small, module-consistent shapes. Odd batch exercises remainder masking.
    in_features = 32
    in_featmap_size = 4
    n_classes = 8
    n_way = 4
    batch = 5

    module = DFMNLossPallas(in_features, in_featmap_size, n_classes, k_w)

    # query_features in PyTorch NCHW layout.
    query_features = jax.random.normal(
        k_x, (batch, in_features, in_featmap_size, in_featmap_size), jnp.float32)
    labels = jax.random.randint(k_l, (batch,), 0, n_way, jnp.int32)
    # global class index -> local (episode) class index
    global_classes_mapping = {3: 0, 1: 1, 6: 2, 0: 3}

    loss = module(query_features, labels, global_classes_mapping, n_way)
    jax.block_until_ready(loss)

    # Pure-JAX cross-check.
    s = in_featmap_size
    qf = query_features.reshape(-1, in_features, s, s)
    query_set = jnp.transpose(qf, (0, 2, 3, 1)).reshape(-1, in_features)
    inv = inverse_mapping(global_classes_mapping)
    idx = jnp.asarray([inv[i] for i in range(n_way)], dtype=jnp.int32)
    protos = jnp.take(module.weight, idx, axis=0)
    exp_labels = jnp.repeat(labels, s * s, axis=0)
    ref = reference_loss(query_set, protos, exp_labels)
    assert jnp.allclose(loss, ref, rtol=1e-4, atol=1e-4), (loss, ref)

    # Second run with a tiny forced tile to exercise multi-step accumulation,
    # the skipped padded grid step, and the partial last block.
    q3 = query_features.reshape(-1, in_features, s * s)
    loss_small_tile = dfmn_loss_pallas(q3, protos, labels, tile_images=2)
    jax.block_until_ready(loss_small_tile)
    assert jnp.allclose(loss_small_tile, ref, rtol=1e-4, atol=1e-4), (loss_small_tile, ref)

    print("KERNEL_OK")
</pallas_src>

<mosaic_0001>
module attributes {stable_mosaic.version = 11 : i64} {
  func.func @_dfmn_loss_kernel(%arg0: i32, %arg1: i32, %arg2: memref<3x32x16xf32, #tpu.memory_space<vmem>>, %arg3: memref<4x32xf32, #tpu.memory_space<vmem>>, %arg4: memref<3x1x1xi32, #tpu.memory_space<vmem>>, %arg5: memref<1x8x128xf32, #tpu.memory_space<vmem>>) attributes {dimension_semantics = [#tpu.dimension_semantics<parallel>, #tpu.dimension_semantics<arbitrary>], iteration_bounds = array<i64: 2, 1>, scalar_prefetch = 0 : i64, scratch_operands = 0 : i64, tpu.core_type = #tpu.core_type<tc>, window_params = [{transform_indices = @transform_0, window_bounds = array<i64: 3, 32, 16>}, {pipeline_mode = #tpu.pipeline_mode<synchronous>, transform_indices = @transform_1, window_bounds = array<i64: 4, 32>}, {transform_indices = @transform_2, window_bounds = array<i64: 3, 1, 1>}, {transform_indices = @transform_3, window_bounds = array<i64: 1, 8, 128>}]} {
    %c0_i32 = arith.constant 0 : i32
    %0 = arith.cmpi eq, %arg1, %c0_i32 : i32
    %1 = arith.extui %0 : i1 to i32
    %c0_i32_0 = arith.constant 0 : i32
    %2 = arith.cmpi ne, %1, %c0_i32_0 : i32
    scf.if %2 {
      %cst = arith.constant 0.000000e+00 : f32
      %9 = vector.broadcast %cst : f32 to vector<1x8x128xf32>
      %c0 = arith.constant 0 : index
      %c0_3 = arith.constant 0 : index
      %c0_4 = arith.constant 0 : index
      %10 = vector.load %arg5[%c0, %c0_3, %c0_4] : memref<1x8x128xf32, #tpu.memory_space<vmem>>, vector<1x8x128xf32>
      tpu.vector_store %arg5[%c0, %c0_3, %c0_4], %9 {strides = array<i32>} : memref<1x8x128xf32, #tpu.memory_space<vmem>>, vector<1x8x128xf32>,
    } else {
    }
    %c1_i32 = arith.constant 1 : i32
    %3 = arith.muli %arg0, %c1_i32 : i32
    %4 = arith.addi %3, %arg1 : i32
    %c1_i32_1 = arith.constant 1 : i32
    %5 = arith.minsi %4, %c1_i32_1 : i32
    %c2_i32 = arith.constant 2 : i32
    %6 = arith.cmpi slt, %4, %c2_i32 : i32
    %7 = arith.extui %6 : i1 to i32
    %c0_i32_2 = arith.constant 0 : i32
    %8 = arith.cmpi ne, %7, %c0_i32_2 : i32
    scf.if %8 {
      %c0 = arith.constant 0 : index
      %c0_3 = arith.constant 0 : index
      %c0_4 = arith.constant 0 : index
      %9 = vector.load %arg2[%c0, %c0_3, %c0_4] : memref<3x32x16xf32, #tpu.memory_space<vmem>>, vector<3x32x16xf32>
      %c0_5 = arith.constant 0 : index
      %c0_6 = arith.constant 0 : index
      %10 = vector.load %arg3[%c0_5, %c0_6] : memref<4x32xf32, #tpu.memory_space<vmem>>, vector<4x32xf32>
      %c0_7 = arith.constant 0 : index
      %c0_8 = arith.constant 0 : index
      %c0_9 = arith.constant 0 : index
      %11 = vector.load %arg4[%c0_7, %c0_8, %c0_9] : memref<3x1x1xi32, #tpu.memory_space<vmem>>, vector<3x1x1xi32>
      %12 = vector.shape_cast %10 : vector<4x32xf32> to vector<1x4x32xf32>
      %13 = vector.shape_cast %12 : vector<1x4x32xf32> to vector<1x4x32xf32>
      %14 = vector.broadcast %13 : vector<1x4x32xf32> to vector<3x4x32xf32>
      "tpu.trace_start"() <{level = 10 : i32, message = "bwc,bcs->bws"}> : () -> ()
      %cst = arith.constant dense<0.000000e+00> : vector<3x4x16xf32>
      %15 = tpu.matmul %14, %9, %cst {dimension_numbers = #tpu.dot_dimension_numbers<[2], [1], [1], [2], [0, 0, 0, 1, 1, 2], [0], [0]>} : vector<3x4x32xf32>, vector<3x32x16xf32>, vector<3x4x16xf32> -> vector<3x4x16xf32>
      "tpu.trace_stop"() : () -> ()
      %16 = arith.mulf %10, %10 : vector<4x32xf32>
      %cst_10 = arith.constant dense<0.000000e+00> : vector<4xf32>
      %17 = vector.multi_reduction <add>, %16, %cst_10 [1] : vector<4x32xf32> to vector<4xf32>
      %18 = vector.shape_cast %17 : vector<4xf32> to vector<4x1xf32>
      %19 = vector.shape_cast %18 : vector<4x1xf32> to vector<1x4x1xf32>
      %cst_11 = arith.constant 2.000000e+00 : f32
      %20 = vector.broadcast %cst_11 : f32 to vector<3x4x16xf32>
      %21 = arith.mulf %20, %15 : vector<3x4x16xf32>
      %22 = vector.broadcast %19 : vector<1x4x1xf32> to vector<3x4x16xf32>
      %23 = arith.subf %21, %22 : vector<3x4x16xf32>
      %cst_12 = arith.constant dense<0xFF800000> : vector<3x16xf32>
      %24 = vector.multi_reduction <maximumf>, %23, %cst_12 [1] : vector<3x4x16xf32> to vector<3x16xf32>
      %25 = vector.shape_cast %24 : vector<3x16xf32> to vector<3x1x16xf32>
      %26 = vector.broadcast %25 : vector<3x1x16xf32> to vector<3x4x16xf32>
      %27 = arith.subf %23, %26 : vector<3x4x16xf32>
      %28 = math.exp %27 : vector<3x4x16xf32>
      %cst_13 = arith.constant dense<0.000000e+00> : vector<3x16xf32>
      %29 = vector.multi_reduction <add>, %28, %cst_13 [1] : vector<3x4x16xf32> to vector<3x16xf32>
      %30 = vector.shape_cast %29 : vector<3x16xf32> to vector<3x1x16xf32>
      %31 = math.log %30 : vector<3x1x16xf32>
      %32 = arith.addf %25, %31 : vector<3x1x16xf32>
      %33 = tpu.iota {dimensions = array<i32: 1>} : vector<3x4x16xi32>
      %34 = vector.broadcast %11 : vector<3x1x1xi32> to vector<3x4x16xi32>
      %35 = arith.cmpi eq, %33, %34 : vector<3x4x16xi32>
      %36 = arith.extui %35 : vector<3x4x16xi1> to vector<3x4x16xi32>
      %37 = arith.sitofp %36 : vector<3x4x16xi32> to vector<3x4x16xf32>
      %38 = arith.mulf %23, %37 : vector<3x4x16xf32>
      %cst_14 = arith.constant dense<0.000000e+00> : vector<3x16xf32>
      %39 = vector.multi_reduction <add>, %38, %cst_14 [1] : vector<3x4x16xf32> to vector<3x16xf32>
      %40 = vector.shape_cast %39 : vector<3x16xf32> to vector<3x1x16xf32>
      %41 = arith.subf %32, %40 : vector<3x1x16xf32>
      %42 = tpu.iota {dimensions = array<i32: 0>} : vector<3x1x1xi32>
      %c3_i32 = arith.constant 3 : i32
      %43 = arith.muli %5, %c3_i32 : i32
      %44 = vector.broadcast %43 : i32 to vector<3x1x1xi32>
      %45 = arith.addi %44, %42 : vector<3x1x1xi32>
      %c5_i32 = arith.constant 5 : i32
      %46 = vector.broadcast %c5_i32 : i32 to vector<3x1x1xi32>
      %47 = arith.cmpi slt, %45, %46 : vector<3x1x1xi32>
      %cst_15 = arith.constant 0.000000e+00 : f32
      %48 = vector.shape_cast %47 : vector<3x1x1xi1> to vector<3x1x1xi1>
      %49 = vector.broadcast %48 : vector<3x1x1xi1> to vector<3x1x16xi1>
      %50 = vector.broadcast %cst_15 : f32 to vector<3x1x16xf32>
      %51 = arith.select %49, %41, %50 : vector<3x1x16xi1>, vector<3x1x16xf32>
      %52 = vector.shape_cast %51 : vector<3x1x16xf32> to vector<1x3x1x16xf32>
      %cst_16 = arith.constant dense<0.000000e+00> : vector<1xf32>
      %53 = vector.multi_reduction <add>, %52, %cst_16 [1, 2, 3] : vector<1x3x1x16xf32> to vector<1xf32>
      %54 = vector.shape_cast %53 : vector<1xf32> to vector<1x1x1x1xf32>
      %55 = vector.extract %54[0, 0, 0, 0] : f32 from vector<1x1x1x1xf32>
      %c0_17 = arith.constant 0 : index
      %c0_18 = arith.constant 0 : index
      %c0_19 = arith.constant 0 : index
      %56 = vector.load %arg5[%c0_17, %c0_18, %c0_19] : memref<1x8x128xf32, #tpu.memory_space<vmem>>, vector<1x8x128xf32>
      %57 = vector.broadcast %55 : f32 to vector<1x8x128xf32>
      %58 = arith.addf %56, %57 : vector<1x8x128xf32>
      %c0_20 = arith.constant 0 : index
      %c0_21 = arith.constant 0 : index
      %c0_22 = arith.constant 0 : index
      %59 = vector.load %arg5[%c0_20, %c0_21, %c0_22] : memref<1x8x128xf32, #tpu.memory_space<vmem>>, vector<1x8x128xf32>
      tpu.vector_store %arg5[%c0_20, %c0_21, %c0_22], %58 {strides = array<i32>} : memref<1x8x128xf32, #tpu.memory_space<vmem>>, vector<1x8x128xf32>,
    } else {
    }
    return
  }
  func.func @transform_0(%arg0: i32, %arg1: i32) -> (i32, i32, i32) {
    %c1_i32 = arith.constant 1 : i32
    %0 = arith.muli %arg0, %c1_i32 : i32
    %1 = arith.addi %0, %arg1 : i32
    %c1_i32_0 = arith.constant 1 : i32
    %2 = arith.minsi %1, %c1_i32_0 : i32
    %c0_i32 = arith.constant 0 : i32
    %c0_i32_1 = arith.constant 0 : i32
    %c0_i32_2 = arith.constant 0 : i32
    return %2, %c0_i32, %c0_i32_1 : i32, i32, i32
  }
  func.func @transform_1(%arg0: i32, %arg1: i32) -> (i32, i32) {
    %c0_i32 = arith.constant 0 : i32
    %c0_i32_0 = arith.constant 0 : i32
    %c0_i32_1 = arith.constant 0 : i32
    return %c0_i32, %c0_i32_0 : i32, i32
  }
  func.func @transform_2(%arg0: i32, %arg1: i32) -> (i32, i32, i32) {
    %c1_i32 = arith.constant 1 : i32
    %0 = arith.muli %arg0, %c1_i32 : i32
    %1 = arith.addi %0, %arg1 : i32
    %c1_i32_0 = arith.constant 1 : i32
    %2 = arith.minsi %1, %c1_i32_0 : i32
    %c0_i32 = arith.constant 0 : i32
    %c0_i32_1 = arith.constant 0 : i32
    %c0_i32_2 = arith.constant 0 : i32
    return %2, %c0_i32, %c0_i32_1 : i32, i32, i32
  }
  func.func @transform_3(%arg0: i32, %arg1: i32) -> (i32, i32, i32) {
    %c0_i32 = arith.constant 0 : i32
    %c0_i32_0 = arith.constant 0 : i32
    %c0_i32_1 = arith.constant 0 : i32
    return %arg0, %c0_i32, %c0_i32_0 : i32, i32, i32
  }
}

</mosaic_0001>

<bundles_post_ra>
// kernel: tpu_custom_call.1
= control target key start
LH: loop header
LB: loop body
LE: loop exit
PB: predicated region body
PF: predicated region fallthrough
CT: control target
= control target key end

     0   :  { %8 = vsyncpa [#allocation3], 0  ;;  %s973_s0 = inlined_call_operand.vmem [shape: f32[5,32,16], index: 0, kind: input, shape index: {}]   ;;  %s974_s1 = inlined_call_operand.vmem [shape: f32[4,32], index: 1, kind: input, shape index: {}]   ;;  %s975_s2 = inlined_call_operand.vmem [shape: s32[5,1,1], index: 2, kind: input, shape index: {}]   ;;  %s976_s3 = inlined_call_operand.hbm [shape: f32[2,8,128], index: 3, kind: output, shape index: {}]  }
   0x1   :  { %10 = vsyncpa [#allocation3 + $0x1], 0  ;;  %s828_s12 = smov 0   ;;  %s830_s13 = smov 0  }
   0x2   :  { %s832_s14 = smov 0   ;;  %s834_s15 = smov 0  }
   0x3   :  { %s836_s16 = smov 0   ;;  %s838_s17 = smov 0  }
   0x4 LB: > { %s628_s18 = sadd.s32 4294967295, %s803_s17   ;;  %s629_s19 = sadd.s32 4294967294, %s803_s17   ;;  %s803_s17 = sphi %s838_s17, %s16_s17   ;;  %s799_s16 = sphi %s836_s16, %s983_s16   ;;  %s795_s15 = sphi %s834_s15, %s982_s15   ;;  %s791_s14 = sphi %s832_s14, %s981_s14   ;;  %s787_s13 = sphi %s830_s13, %s980_s13   ;;  %s783_s12 = sphi %s828_s12, %s979_s12  }
   0x5   : > { %s28_s20 = sadd.s32 1, %s799_s16  ;;  %s120_s21 = sadd.s32 1, %s791_s14 }
   0x6   : > { %p30_p0 = scmp.ge.s32.totalorder %s28_s20, 2  ;;  %p130_p1 = scmp.ne.s32.totalorder %s791_s14, %s787_s13 }
   0x7   : > { %p131_p2 = scmp.eq.s32.totalorder %s628_s18, 1  ;;  %p136_p3 = scmp.ne.s32.totalorder %s787_s13, %s783_s12 }
   0x8   : > { %s985_s20 = smov (%p30_p0, %s28_s20), 0  ;;  %p137_p5 = scmp.eq.s32.totalorder %s629_s19, 1 }
   0x9   : > { %p868_p4 = por %p131_p2, %p130_p1  ;;  %s117_s23 = ssub.s32 %s799_s16, %s985_s20 }
   0xa   : > { %p632_p6 = scmp.ge.s32.totalorder %s803_s17, 1  ;;  %p118_p7 = scmp.eq.s32.totalorder %s117_s23, 0 }
   0xb   : > { %p875_p8 = por %p137_p5, %p136_p3  ;;  %p204_p9 = scmp.lt.s32.totalorder %s803_s17, 3 }
   0xc   : > { %s881_s25 = scalar_select %p118_p7, %s791_s14, %s120_s21  }
   0xd   : > { %p205_p10 = pnand %p632_p6, %p204_p9 }
   0xe   : > { %s244_s26 = sand.u32 (!%p205_p10), 1, %s787_s13   ;;  %p248_p11 = scmp.lt.s32.totalorder (!%p205_p10), %s795_s15, 1 }
   0xf   : > { %208 = sbr.rel (%p205_p10) target bundleno = 427 (0x1ab), region = 32  ;;  %s633_s27 = sshll.u32 (!%p205_p10), %s244_s26, 3 }
  0x10   : > { %s888_s29 = scalar_lea.vmem (!%p205_p10), [#allocation2], %s633_s27  ;;  %p636_p13 = scmp.ge.s32.totalorder (!%p205_p10), %s795_s15, 2 }
  0x14   : > { %s249_s28 = scalar_select %p248_p11, %s795_s15, 1  ;;  %v805_v0 = vmov 0.0  }
  0x15   : > { %291 = vst [vmem:[%s888_s29] sm:$0xff] %v805_v0 }
  0x16   : > { %s891_s30 = smul.u32 3, %s249_s28 }
  0x18   : > { %p256_p12 = scmp.lt.s32.totalorder %s891_s30, 4 }
  0x19   : > { %298 = sbr.rel (%p636_p13) target bundleno = 412 (0x19c), region = 40 }
  0x1a   : > { %s257_s4 = scalar_select %p256_p12, %s891_s30, 4 }
  0x1c   : > { %s647_s5 = sshll.u32 %s257_s4, 5  ;;  %s898_s8 = scalar_lea.vmem %s975_s2, %s257_s4 }
  0x1d   : > { %s260_s11 = scalar_lea.vmem %s973_s0, %s647_s5 }
  0x1e   : > { %v302_v1 = vld [vmem:[%s260_s11 + $0x18] sm:$0xff]  ;;  %v301_v4 = vld [vmem:[%s260_s11 + $0x10] sm:$0xff]  ;;  %v311_v7 = vld [vmem:[%s974_s1] sm:$0xf]  ;;  %vm380_vm0 = vcmask 257024   ;;  %v806_v10 = vmov 0   ;;  %v451_v37 = vlaneseq }
  0x1f   : > { %v306_v2 = vld [vmem:[%s260_s11 + $0x38] sm:$0xff]  ;;  %331 = vmatpush.msra.mxu0 %v302_v1  ;;  %v305_v5 = vld [vmem:[%s260_s11 + $0x30] sm:$0xff]  ;;  %v300_v8 = vld [vmem:[%s260_s11 + $0x8] sm:$0xff]  ;;  %709 = vset.pattern.permute.xlu1 %v806_v10  ;;  %v379_v11 = vmul.f32 %v311_v7, %v311_v7  ;;  %vm315_vm1 = vcmask 261120   ;;  %vm390_vm2 = vcmask 125952   ;;  %v807_v57 = vmov 0.0  }
  0x20   : > { %v310_v3 = vld [vmem:[%s260_s11 + $0x58] sm:$0xff]  ;;  %351 = vmatpush.msra.mxu1 %v306_v2  ;;  %v309_v6 = vld [vmem:[%s260_s11 + $0x50] sm:$0xff]  ;;  %v304_v9 = vld [vmem:[%s260_s11 + $0x28] sm:$0xff]  ;;  %708 = vset.pattern.permute.xlu0 %v806_v10  ;;  %v452_v45 = vshrl.u32 %v451_v37, 7  ;;  %vm517_vm8 = vcmask 122880  }
  0x21   : > { %371 = vmatpush.msra.mxu2 %v310_v3  ;;  %332 = vmatpush.msra.mxu0 %v301_v4  ;;  %v308_v12 = vld [vmem:[%s260_s11 + $0x48] sm:$0xff]  ;;  %v299_v13 = vld [vmem:[%s260_s11] sm:$0xff]  ;;  %v381_v15 = vsel %vm380_vm0, %v379_v11, 0.0 }
  0x22   : > { %352 = vmatpush.msra.mxu1 %v305_v5  ;;  %v303_v14 = vld [vmem:[%s260_s11 + $0x20] sm:$0xff]  ;;  %382 = vadd.xlane.f32.xlu0 %v381_v15 }
  0x23   : > { %372 = vmatpush.msra.mxu2 %v309_v6  ;;  %333 = vmatpush.msra.mxu0 %v300_v8  ;;  %v307_v16 = vld [vmem:[%s260_s11 + $0x40] sm:$0xff] }
  0x24   : > { %353 = vmatpush.msra.mxu1 %v304_v9  ;;  %v710_v17 = vld [vmem:[%s898_s8 + $0x1] ss:$0 sm:$0xff]  ;;  %v712_v18 = vld [vmem:[%s898_s8 + $0x2] ss:$0 sm:$0xff]  ;;  %v711_v19 = vld [vmem:[%s898_s8] ss:$0 sm:$0xff] }
  0x25   : > { %373 = vmatpush.msra.mxu2 %v308_v12  ;;  %334 = vmatpush.msra.mxu0 %v299_v13 }
  0x26   : > { %354 = vmatpush.msra.mxu1 %v303_v14  ;;  %637 = vmatmul.msk.f32.vlgmr.msra.gmra.mxu0 %vm315_vm1, %v311_v7 }
  0x27   : > { %374 = vmatpush.msra.mxu2 %v307_v16  ;;  %638 = vmatmul.msk.f32.vlgmr.msra.gmra.mxu1 %vm315_vm1, %v311_v7 }
  0x28   : > { %639 = vmatmul.msk.f32.vlgmr.msra.gmra.mxu2 %vm315_vm1, %v311_v7  ;;  %460 = vperm.xlu1 %709, %v710_v17  }
  0x30   : > { %463 = vperm.xlu1 %709, %v712_v18  }
  0x36   : > { %457 = vperm.xlu0 %708, %v711_v19  }
  0x95   : > { %v383_v23 = vpop.xlane.xlu0 %382 }
  0x9a   : > { %v461_v39 = vpop.permute.xlu1 %460 }
  0x9b   : > { %vm466_vm4 = vcmp.eq.s32.totalorder %v452_v45, %v461_v39 }
  0x9c   : > { %v641_v60 = vsel %vm466_vm4, 1.0, %v807_v57 }
  0xa2   : > { %v464_v61 = vpop.permute.xlu1 %463 }
  0xa3   : > { %v336_v20 = vpop.f32.mrf.mxu0  ;;  %vm467_vm5 = vcmp.eq.s32.totalorder %v452_v45, %v464_v61 }
  0xa4   : > { %v384_v21 = vmul.f32 2.0, %v336_v20  ;;  %v356_v22 = vpop.f32.mrf.mxu1  ;;  %v642_v5 = vsel %vm467_vm5, 1.0, %v807_v57 }
  0xa5   : > { %v385_v24 = vmul.f32 2.0, %v356_v22 }
  0xa6   : > { %v387_v25 = vsub.f32 %v384_v21, %v383_v23 }
  0xa7   : > { %v388_v26 = vsub.f32 %v385_v24, %v383_v23 }
  0xa8   : > { %v391_v27 = vsel %vm390_vm2, %v387_v25, -inf  ;;  %v458_v47 = vpop.permute.xlu0 %457 }
  0xa9   : > { %v392_v28 = vrot.slane %v391_v27, 4  ;;  %v398_v29 = vsel %vm390_vm2, %v388_v26, -inf  ;;  %vm465_vm3 = vcmp.eq.s32.totalorder %v452_v45, %v458_v47  ;;  %v475_v0 = vmul.f32 %v641_v60, %v388_v26 }
  0xaa   : > { %v399_v30 = vrot.slane %v398_v29, 4  ;;  %v640_v58 = vsel %vm465_vm3, 1.0, %v807_v57 }
  0xab   : > { %v376_v31 = vpop.f32.mrf.mxu2  ;;  %v393_v32 = vmax.f32 %v391_v27, %v392_v28  ;;  %v474_v63 = vmul.f32 %v640_v58, %v387_v25  ;;  %v484_v8 = vsel %vm390_vm2, %v475_v0, 0.0 }
  0xac   : > { %v386_v33 = vmul.f32 2.0, %v376_v31  ;;  %v400_v34 = vmax.f32 %v398_v29, %v399_v30  ;;  %v485_v15 = vrot.slane %v484_v8, 4 }
  0xad   : > { %v394_v35 = vrot.slane %v393_v32, 2  ;;  %v477_v4 = vsel %vm390_vm2, %v474_v63, 0.0 }
  0xae   : > { %v389_v36 = vsub.f32 %v386_v33, %v383_v23  ;;  %v401_v38 = vrot.slane %v400_v34, 2  ;;  %v478_v12 = vrot.slane %v477_v4, 4  ;;  %v486_v22 = vadd.f32 %v485_v15, %v484_v8 }
  0xaf   : > { %v395_v40 = vmax.f32 %v393_v32, %v394_v35 }
  0xb0   : > { %v405_v41 = vsel %vm390_vm2, %v389_v36, -inf  ;;  %v402_v42 = vmax.f32 %v400_v34, %v401_v38  ;;  %v476_v13 = vmul.f32 %v642_v5, %v389_v36  ;;  %v479_v19 = vadd.f32 %v478_v12, %v477_v4 }
  0xb1   : > { %v406_v43 = vrot.slane %v405_v41, 4  ;;  %v396_v44 = vrot.slane %v395_v40, 1  ;;  %v487_v32 = vrot.slane %v486_v22, 2 }
  0xb2   : > { %v403_v46 = vrot.slane %v402_v42, 1  ;;  %v491_v20 = vsel %vm390_vm2, %v476_v13, 0.0  ;;  %v480_v29 = vrot.slane %v479_v19, 2 }
  0xb3   : > { %v407_v48 = vmax.f32 %v405_v41, %v406_v43  ;;  %v913_v49 = vmax.f32 %v395_v40, %v396_v44  ;;  %v492_v27 = vrot.slane %v491_v20, 4  ;;  %v488_v39 = vadd.f32 %v487_v32, %v486_v22 }
  0xb4   : > { %v915_v50 = vmax.f32 %v402_v42, %v403_v46  ;;  %v481_v37 = vadd.f32 %v480_v29, %v479_v19  ;;  %v502_v42 = vstv %s891_s30 }
  0xb5   : > { %v408_v51 = vrot.slane %v407_v48, 2  ;;  %v412_v52 = vsub.f32 %v387_v25, %v913_v49  ;;  %v489_v46 = vrot.slane %v488_v39, 1  ;;  %vm505_vm6 = vcmp.lt.s32.totalorder %v502_v42, 5 }
  0xb6   : > { %v413_v53 = vsub.f32 %v388_v26, %v915_v50  ;;  %v482_v43 = vrot.slane %v481_v37, 1  ;;  %v504_v63 = vadd.s32 2, %v502_v42 }
  0xb7   : > { %v409_v54 = vmax.f32 %v407_v48, %v408_v51  ;;  %v415_v55 = vmul.f32 1.442695, %v412_v52  ;;  %v503_v51 = vadd.s32 1, %v502_v42  ;;  %v490_v57 = vadd.f32 %v489_v46, %v488_v39 }
  0xb8   : > { %v417_v56 = vmul.f32 1.442695, %v413_v53  ;;  %vm507_vm9 = vcmp.lt.s32.totalorder %v504_v63, 5 }
  0xb9   : > { %v410_v59 = vrot.slane %v409_v54, 1  ;;  %713 = vpow2.f32 %v415_v55  ;;  %v483_v55 = vadd.f32 %v482_v43, %v481_v37  ;;  %vm506_vm7 = vcmp.lt.s32.totalorder %v503_v51, 5 }
  0xba   : > { %715 = vpow2.f32 %v417_v56 }
  0xbb   : > { %v919_v62 = vmax.f32 %v409_v54, %v410_v59 }
  0xbd   : > { %v414_v1 = vsub.f32 %v389_v36, %v919_v62  ;;  %v493_v36 = vadd.f32 %v492_v27, %v491_v20 }
  0xbf   : > { %v419_v2 = vmul.f32 1.442695, %v414_v1  ;;  %v714_v3 = vpop.eup %713  ;;  %v494_v41 = vrot.slane %v493_v36, 2 }
  0xc0   : > { %v716_v6 = vpop.eup %715  ;;  %v421_v7 = vsel %vm390_vm2, %v714_v3, 0.0 }
  0xc1   : > { %717 = vpow2.f32 %v419_v2  ;;  %v422_v9 = vrot.slane %v421_v7, 4  ;;  %v428_v10 = vsel %vm390_vm2, %v716_v6, 0.0  ;;  %v495_v52 = vadd.f32 %v494_v41, %v493_v36 }
  0xc2   : > { %v429_v11 = vrot.slane %v428_v10, 4 }
  0xc3   : > { %v423_v14 = vadd.f32 %v422_v9, %v421_v7  ;;  %v496_v59 = vrot.slane %v495_v52, 1 }
  0xc4   : > { %v430_v16 = vadd.f32 %v429_v11, %v428_v10 }
  0xc5   : > { %v424_v17 = vrot.slane %v423_v14, 2  ;;  %v497_v4 = vadd.f32 %v496_v59, %v495_v52 }
  0xc6   : > { %v431_v21 = vrot.slane %v430_v16, 2 }
  0xc7   : > { %v718_v18 = vpop.eup %717  ;;  %v425_v24 = vadd.f32 %v424_v17, %v423_v14 }
  0xc8   : > { %v435_v23 = vsel %vm390_vm2, %v718_v18, 0.0  ;;  %v432_v26 = vadd.f32 %v431_v21, %v430_v16 }
  0xc9   : > { %v436_v25 = vrot.slane %v435_v23, 4  ;;  %v426_v28 = vrot.slane %v425_v24, 1 }
  0xca   : > { %v433_v30 = vrot.slane %v432_v26, 1 }
  0xcb   : > { %v437_v31 = vadd.f32 %v436_v25, %v435_v23  ;;  %v427_v33 = vadd.f32 %v426_v28, %v425_v24 }
  0xcc   : > { %v434_v34 = vadd.f32 %v433_v30, %v432_v26 }
  0xcd   : > { %v438_v35 = vrot.slane %v437_v31, 2  ;;  %719 = vlog2.f32 %v427_v33 }
  0xce   : > { %721 = vlog2.f32 %v434_v34 }
  0xcf   : > { %v439_v38 = vadd.f32 %v438_v35, %v437_v31 }
  0xd1   : > { %v440_v40 = vrot.slane %v439_v38, 1 }
  0xd3   : > { %v441_v44 = vadd.f32 %v440_v40, %v439_v38  ;;  %v720_v45 = vpop.eup %719 }
  0xd4   : > { %v722_v47 = vpop.eup %721  ;;  %v443_v48 = vmul.f32 0.6931472, %v720_v45 }
  0xd5   : > { %723 = vlog2.f32 %v441_v44  ;;  %v445_v53 = vmul.f32 0.6931472, %v722_v47 }
  0xd6   : > { %v448_v54 = vadd.f32 %v443_v48, %v913_v49 }
  0xd7   : > { %v449_v56 = vadd.f32 %v445_v53, %v915_v50 }
  0xd8   : > { %v498_v58 = vsub.f32 %v448_v54, %v483_v55 }
  0xd9   : > { %v499_v60 = vsub.f32 %v449_v56, %v490_v57 }
  0xda   : > { %v514_v1 = vsel %vm505_vm6, %v498_v58, 0.0 }
  0xdb   : > { %v724_v61 = vpop.eup %723  ;;  %v515_v2 = vsel %vm506_vm7, %v499_v60, 0.0  ;;  %v518_v49 = vsel %vm517_vm8, %v514_v1, 0.0 }
  0xdc   : > { %v447_v0 = vmul.f32 0.6931472, %v724_v61  ;;  %v519_v5 = vsel %vm517_vm8, %v515_v2, 0.0 }
  0xdd   : > { %v520_v7 = vadd.f32 %v519_v5, %v518_v49 }
  0xde   : > { %v450_v3 = vadd.f32 %v447_v0, %v919_v62  ;;  %v532_v62 = vld [vmem:[%s888_s29] sm:$0xff] }
  0xe0   : > { %v500_v50 = vsub.f32 %v450_v3, %v497_v4 }
  0xe2   : > { %v516_v6 = vsel %vm507_vm9, %v500_v50, 0.0 }
  0xe3   : > { %v521_v8 = vsel %vm517_vm8, %v516_v6, 0.0 }
  0xe4   : > { %v522_v9 = vadd.f32 %v521_v8, %v520_v7 }
  0xe6   : > { %523 = vadd.xlane.f32.xlu2 %v522_v9 }
 0x159   : > { %v524_v10 = vpop.xlane.xlu2 %523 }
 0x15a   : > { %v525_v11 = vrot.slane %v524_v10, 4 }
 0x15c   : > { %v526_v12 = vadd.f32 %v525_v11, %v524_v10 }
 0x15e   : > { %v527_v13 = vrot.slane %v526_v12, 2 }
 0x160   : > { %v528_v14 = vadd.f32 %v527_v13, %v526_v12 }
 0x162   : > { %v529_v15 = vrot.slane %v528_v14, 1 }
 0x164   : > { %v530_v16 = vadd.f32 %v529_v15, %v528_v14 }
 0x166   : > { %648 = vpush %v530_v16 }
 0x197   : > { %s649_s21 = spop %648 }
 0x198   : > { %v533_v17 = vstv %s649_s21 }
 0x199   : > { %v534_v18 = vadd.f32 %v533_v17, %v532_v62 }
 0x19b   : > { %535 = vst [vmem:[%s888_s29] sm:$0xff] %v534_v18 }
 0x19c PF: > { %s644_s23 = sshll.u32 %s795_s15, 3  ;;  %s549_s4 = sshll.u32 %s888_s29, 4  ;;  %s550_s4 = int_to_ptr.vmem [resolvable:$true] %s549_s4 }
 0x19d   : > { %s547_s30 = scalar_lea.hbm %s976_s3, %s644_s23  ;;  %s537_s6 = scalar_lea.sflag [#allocation3], %s244_s26 }
 0x19e   : > { %s551_s5 = sshll.u32 %s547_s30, 4  ;;  %s745_s15 = scalar_lea.hbm %s976_s3, 16  ;;  %s552_s5 = int_to_ptr.hbm [resolvable:$true] %s551_s5 }
 0x19f   : > { %s739_s7 = sshra.s32 %s552_s5, 4  ;;  %s740_s7 = int_to_ptr.hbm [resolvable:$true] %s739_s7 }
 0x1a0   : > { %s741_s8 = scalar_lea.hbm %s740_s7, 8  ;;  %p746_p3 = scmp.lt.s32.totalorder %s740_s7, %s976_s3 }
 0x1a1   : > { %p742_p0 = scmp.ne.s32.totalorder %s740_s7, %s741_s8  ;;  %p747_p5 = scmp.lt.s32.totalorder %s745_s15, %s741_s8 }
 0x1a3   : > { %p743_p1 = pnand %p742_p0, %p868_p4  ;;  %p748_p6 = por %p747_p5, %p746_p3 }
 0x1a5   : > { %p744_p2 = pneg %p743_p1 }
 0x1a7   : > { %p749_p7 = pnand %p748_p6, %p744_p2 }
 0x1a9   : > { %752 = shalt.err (!%p749_p7)
}
 0x1aa   : > { %650 = dma.vmem_to_hbm [thread:$0]  (%p868_p4), %s550_s4, 128, %s552_s5, %s537_s6  }
 0x1ab PF: > { %p656_p9 = scmp.ge.s32.totalorder %s803_s17, 2  ;;  %s563_s26 = sand.u32 1, %s783_s12  }
 0x1ac   : > { %s564_s29 = scalar_lea.sflag [#allocation3], %s563_s26 }
 0x1ad   : > { %p653_p10 = pnand %p656_p9, %p875_p8 }
 0x1af   : > { %p654_p11 = pneg %p653_p10 }
 0x1b1   : > { %778 = dma.done.wait (%p654_p11), %s564_s29, 128  }
 0x1b2   : > { %780 = vsyncadd (%p654_p11), %s564_s29, 4294967168  ;;  %s16_s17 = sadd.s32 1, %s803_s17   ;;  %s979_s12 = smov %s787_s13 }
 0x1b3   : > { %p13_p12 = scmp.ge.s32.totalorder %s16_s17, 4   ;;  %s980_s13 = smov %s791_s14 }
 0x1b4   : > { %s981_s14 = smov %s881_s25  ;;  %s982_s15 = smov %s799_s16 }
 0x1b5   : > { %s983_s16 = smov %s985_s20  ;;  %15 = sbr.rel (!%p13_p12) target bundleno = 4 (0x4), region = 78 }
 0x1ba   :  { %570 = vsyncpa [#allocation3], 1 }
 0x1bb   :  { %572 = vsyncpa [#allocation3 + $0x1], 1 }

</bundles_post_ra>
